<compile_context>
chip_gen: v6e
topology: v6e:2x2x1
jax: 0.10.0
libtpu: 0.0.40
codegen_flags: <defaults>
</compile_context>

<pallas_src>
import functools

import jax
import jax.numpy as jnp
import numpy as np
from jax.experimental import pallas as pl
from jax.experimental.pallas import tpu as pltpu

SCALES = (1.0, 2.0, 4.0)
N_SCALES = len(SCALES)
_LANE = 128
_SUBLANE = 8


def _round_up(n, m):
    return ((n + m - 1) // m) * m


def _cdiv(a, b):
    return (a + b - 1) // b


# ---------------------------------------------------------------------------
# Kernel
# ---------------------------------------------------------------------------
def _msi_kernel(*refs, has_points):
    if has_points:
        feat_ref, pts_ref = refs[0], refs[1]
        wrefs = refs[2:-1]
    else:
        feat_ref, pts_ref = refs[0], None
        wrefs = refs[1:-1]
    out_ref = refs[-1]

    (w1_0, b1_0, w2_0, b2_0,
     w1_1, b1_1, w2_1, b2_1,
     w1_2, b1_2, w2_2, b2_2,
     wa1_0, wa1_1, wa1_2, ba1,
     wa2, ba2, we1, be1, we2, be2) = wrefs

    x_f32 = feat_ref[...]                        # (TM, Fp) f32 — residual path
    x = x_f32.astype(jnp.bfloat16)               # MXU operand

    if has_points:
        # Only TM*3 distinct modulation values exist: one cross-lane sum, then
        # a (TM, 1) tanh per scale (instead of tanh over a (TM, 3F) slab).
        s = jnp.sum(pts_ref[...], axis=-1, keepdims=True)           # (TM, 1)

    scale_w = ((w1_0, b1_0, w2_0, b2_0),
               (w1_1, b1_1, w2_1, b2_1),
               (w1_2, b1_2, w2_2, b2_2))

    sf = []
    for i, (w1, b1, w2, b2) in enumerate(scale_w):
        h = jnp.dot(x, w1[...], preferred_element_type=jnp.float32) + b1[...]
        h = jnp.maximum(h, 0.0)
        f = jnp.dot(h.astype(jnp.bfloat16), w2[...],
                    preferred_element_type=jnp.float32) + b2[...]
        if has_points:
            f = f * (1.0 + jnp.tanh(s * (1.0 / SCALES[i])))
        sf.append(f)                                               # (TM, Fp) f32

    # Scale attention.  wa1 was pre-split (outside the kernel) into the three
    # per-segment chunks of the original concat, so ah below is exactly
    # relu(concat(sf) @ wa1 + ba1) without materializing the concat.
    wa1_chunks = (wa1_0, wa1_1, wa1_2)
    ah = ba1[...]
    for i in range(N_SCALES):
        ah = ah + jnp.dot(sf[i].astype(jnp.bfloat16), wa1_chunks[i][...],
                          preferred_element_type=jnp.float32)
    ah = jnp.maximum(ah, 0.0)
    logits = jnp.dot(ah.astype(jnp.bfloat16), wa2[...],
                     preferred_element_type=jnp.float32) + ba2[...]  # (TM, 3)
    m = jnp.max(logits, axis=-1, keepdims=True)
    e = jnp.exp(logits - m)
    att = e * pl.reciprocal(jnp.sum(e, axis=-1, keepdims=True), approx=True)

    weighted = (sf[0] * att[:, 0:1]
                + sf[1] * att[:, 1:2]
                + sf[2] * att[:, 2:3])                              # (TM, Fp)

    # Enhancement: Linear(F->mid) -> ReLU -> Linear(mid->F), residual add.
    eh = jnp.dot(weighted.astype(jnp.bfloat16), we1[...],
                 preferred_element_type=jnp.float32) + be1[...]
    eh = jnp.maximum(eh, 0.0)
    enh = jnp.dot(eh.astype(jnp.bfloat16), we2[...],
                  preferred_element_type=jnp.float32) + be2[...]

    out_ref[...] = enh + x_f32


# ---------------------------------------------------------------------------
# Parameters
# ---------------------------------------------------------------------------
def init_params(feature_dim, key):
    """Deterministic synthetic parameters (PyTorch-style uniform fan-in init).

    Layout matches the nn.Module: per-scale (w1, b1, w2, b2), then attention
    (wa1, ba1, wa2, ba2), then enhancement (we1, be1, we2, be2).
    Weights are [in_dim, out_dim]; biases (1, out_dim). All f32.
    """
    mid = feature_dim // 2

    def lin(key, fan_in, fan_out):
        k1, k2 = jax.random.split(key)
        bound = 1.0 / np.sqrt(fan_in)
        w = jax.random.uniform(k1, (fan_in, fan_out), jnp.float32, -bound, bound)
        b = jax.random.uniform(k2, (fan_out,), jnp.float32, -bound, bound)
        return w, b.reshape(1, fan_out)

    keys = jax.random.split(key, N_SCALES * 2 + 2 + 2)
    params = []
    ki = 0
    for _ in range(N_SCALES):
        w1, b1 = lin(keys[ki], feature_dim, mid); ki += 1
        w2, b2 = lin(keys[ki], mid, feature_dim); ki += 1
        params += [w1, b1, w2, b2]
    wa1, ba1 = lin(keys[ki], feature_dim * N_SCALES, feature_dim); ki += 1
    wa2, ba2 = lin(keys[ki], feature_dim, N_SCALES); ki += 1
    params += [wa1, ba1, wa2, ba2]
    we1, be1 = lin(keys[ki], feature_dim, mid); ki += 1
    we2, be2 = lin(keys[ki], mid, feature_dim); ki += 1
    params += [we1, be1, we2, be2]
    return params


def prepare_params(params):
    """Kernel-ready weights: wa1 split per segment, feature dim zero-padded to
    a multiple of 128 (lane-dense output / exact math), weight matrices cast
    to bf16 for the MXU, biases kept f32 (added after f32 accumulation)."""
    (w10, b10, w20, b20, w11, b11, w21, b21, w12, b12, w22, b22,
     wa1, ba1, wa2, ba2, we1, be1, we2, be2) = params
    fdim = w10.shape[0]
    fp = _round_up(fdim, _LANE)

    def pad_rows(w):
        return jnp.pad(w, ((0, fp - w.shape[0]), (0, 0)))

    def pad_cols(w):
        return jnp.pad(w, ((0, 0), (0, fp - w.shape[1])))

    def mxu(w):
        return w.astype(jnp.bfloat16)

    out = []
    for w1, b1, w2, b2 in ((w10, b10, w20, b20),
                           (w11, b11, w21, b21),
                           (w12, b12, w22, b22)):
        out += [mxu(pad_rows(w1)), b1.astype(jnp.float32),
                mxu(pad_cols(w2)), pad_cols(b2).astype(jnp.float32)]
    # Attention layer-1: split in the original concat order, pad both dims.
    for i in range(N_SCALES):
        chunk = wa1[i * fdim:(i + 1) * fdim, :]
        out.append(mxu(pad_cols(pad_rows(chunk))))
    out.append(pad_cols(ba1).astype(jnp.float32))
    out += [mxu(pad_rows(wa2)), ba2.astype(jnp.float32)]
    out += [mxu(pad_rows(we1)), be1.astype(jnp.float32),
            mxu(pad_cols(we2)), pad_cols(be2).astype(jnp.float32)]
    return tuple(out)


# ---------------------------------------------------------------------------
# pallas_call wrapper
# ---------------------------------------------------------------------------
@functools.partial(jax.jit, static_argnames=("tile_rows", "vmem_limit"))
def _msi_pallas(feat2d, pts2d, kparams, *, tile_rows, vmem_limit):
    rows, fp = feat2d.shape
    has_points = pts2d is not None
    grid = (rows // tile_rows,)

    def full_spec(p):
        # NOTE: these blocks never change across grid steps; single-buffering
        # them (pipeline_mode=pl.Buffered(1)) would halve their VMEM on v7x,
        # omitted here to keep the lowering path maximally compatible.
        return pl.BlockSpec(p.shape, lambda i: (0, 0))

    in_specs = [pl.BlockSpec((tile_rows, fp), lambda i: (i, 0))]
    args = [feat2d]
    if has_points:
        pdim = pts2d.shape[1]
        in_specs.append(pl.BlockSpec((tile_rows, pdim), lambda i: (i, 0)))
        args.append(pts2d)
    in_specs += [full_spec(p) for p in kparams]
    args += list(kparams)

    kernel = functools.partial(_msi_kernel, has_points=has_points)

    return pl.pallas_call(
        kernel,
        out_shape=jax.ShapeDtypeStruct((rows, fp), jnp.float32),
        grid_spec=pltpu.PrefetchScalarGridSpec(
            num_scalar_prefetch=0,
            grid=grid,
            in_specs=in_specs,
            out_specs=pl.BlockSpec((tile_rows, fp), lambda i: (i, 0)),
        ),
        compiler_params=pltpu.CompilerParams(
            dimension_semantics=("parallel",),
            vmem_limit_bytes=vmem_limit),
    )(*args)


def multi_scale_integration(features, kernel_params, points=None,
                            tile_rows=512):
    """features: (..., F); points (optional): (..., P) with matching leading dims."""
    fdim = features.shape[-1]
    lead = features.shape[:-1]
    fp = kernel_params[0].shape[0]          # lane-dense (padded) feature dim
    feat2d = features.reshape(-1, fdim).astype(jnp.float32)
    rows = feat2d.shape[0]

    # Row tiling: cap the tile so the live activation slabs stay well under a
    # ~24 MiB budget (safe for v7x's 64 MiB physical VMEM and v5e's smaller
    # scoped default), then balance tiles over the actual row count (tail
    # padding < 8 rows per tile) and force >= 2 grid steps so both v7x
    # TensorCores get work.
    act_budget = 24 * 1024 * 1024
    cap = max(_SUBLANE, (act_budget // (48 * fp)) // _SUBLANE * _SUBLANE)
    target = max(_SUBLANE, min(tile_rows, cap))
    n_tiles = _cdiv(rows, target)
    if rows >= 2 * _SUBLANE:
        n_tiles = max(n_tiles, 2)
    tr = _round_up(_cdiv(rows, n_tiles), _SUBLANE)
    padded_rows = n_tiles * tr

    feat2d = jnp.pad(feat2d, ((0, padded_rows - rows), (0, fp - fdim)))

    if points is None:
        pts2d = None
    else:
        pdim = points.shape[-1]
        pts2d = points.reshape(-1, pdim).astype(jnp.float32)
        pts2d = jnp.pad(pts2d, ((0, padded_rows - rows), (0, 0)))

    # Explicit scoped-VMEM hint: double-buffered weights + I/O slabs + headroom.
    wbytes = sum(int(np.prod(p.shape)) * p.dtype.itemsize for p in kernel_params)
    est = 2 * wbytes + 12 * tr * fp * 4
    vmem_limit = int(min(64 * 2**20, max(2 * est, 32 * 2**20)))

    out = _msi_pallas(feat2d, pts2d, tuple(kernel_params),
                      tile_rows=tr, vmem_limit=vmem_limit)
    return out[:rows, :fdim].reshape(*lead, fdim)


# ---------------------------------------------------------------------------
# Pure-JAX reference (matches the PyTorch forward, f32)
# ---------------------------------------------------------------------------
def _reference(features, params, points=None):
    (w10, b10, w20, b20, w11, b11, w21, b21, w12, b12, w22, b22,
     wa1, ba1, wa2, ba2, we1, be1, we2, be2) = params
    sp = ((w10, b10, w20, b20), (w11, b11, w21, b21), (w12, b12, w22, b22))
    msf = []
    for (w1, b1, w2, b2), s in zip(sp, SCALES):
        sf = jnp.maximum(features @ w1 + b1, 0) @ w2 + b2
        if points is not None:
            sf = sf * (1 + jnp.tanh(jnp.sum(points / s, -1, keepdims=True)))
        msf.append(sf)
    concat = jnp.concatenate(msf, -1)
    att = jax.nn.softmax(jnp.maximum(concat @ wa1 + ba1, 0) @ wa2 + ba2, -1)
    weighted = sum(sf * att[..., i:i + 1] for i, sf in enumerate(msf))
    enh = jnp.maximum(weighted @ we1 + be1, 0) @ we2 + be2
    return enh + features


# ---------------------------------------------------------------------------
# Demo / self-test
# ---------------------------------------------------------------------------
if __name__ == "__main__":
    B, N, F = 2, 8, 32       # batch=2, seq=8, feature_dim=32 (mid=16)
    key = jax.random.PRNGKey(0)
    k_feat, k_pts, k_par = jax.random.split(key, 3)

    features = jax.random.normal(k_feat, (B, N, F), jnp.float32)
    points = jax.random.normal(k_pts, (B, N, 3), jnp.float32)
    params = init_params(F, k_par)
    kparams = prepare_params(params)

    # bf16 MXU operands -> compare against the f32 reference at a loosened
    # tolerance (per review guidance).
    TOL = dict(atol=5e-2, rtol=5e-2)

    # points=None path (module default)
    out = multi_scale_integration(features, kparams, points=None)
    jax.block_until_ready(out)
    ref = _reference(features, params, points=None)
    assert np.allclose(np.asarray(out), np.asarray(ref), **TOL), \
        "mismatch (no points)"

    # points path
    out_p = multi_scale_integration(features, kparams, points=points)
    jax.block_until_ready(out_p)
    ref_p = _reference(features, params, points=points)
    assert np.allclose(np.asarray(out_p), np.asarray(ref_p), **TOL), \
        "mismatch (points)"

    # non-multiple row count -> exercises the balanced tail-tile handling
    k2a, k2b = jax.random.split(jax.random.PRNGKey(1))
    features_r = jax.random.normal(k2a, (3, 7, F), jnp.float32)
    points_r = jax.random.normal(k2b, (3, 7, 3), jnp.float32)
    out_r = multi_scale_integration(features_r, kparams, points=points_r)
    jax.block_until_ready(out_r)
    ref_r = _reference(features_r, params, points=points_r)
    assert np.allclose(np.asarray(out_r), np.asarray(ref_r), **TOL), \
        "mismatch (ragged rows)"

    print("KERNEL_OK")
</pallas_src>

<mosaic_0001>
module attributes {stable_mosaic.version = 11 : i64} {
  func.func @_msi_kernel(%arg0: i32, %arg1: memref<8x128xf32, #tpu.memory_space<vmem>>, %arg2: memref<128x16xbf16, #tpu.memory_space<vmem>>, %arg3: memref<1x16xf32, #tpu.memory_space<vmem>>, %arg4: memref<16x128xbf16, #tpu.memory_space<vmem>>, %arg5: memref<1x128xf32, #tpu.memory_space<vmem>>, %arg6: memref<128x16xbf16, #tpu.memory_space<vmem>>, %arg7: memref<1x16xf32, #tpu.memory_space<vmem>>, %arg8: memref<16x128xbf16, #tpu.memory_space<vmem>>, %arg9: memref<1x128xf32, #tpu.memory_space<vmem>>, %arg10: memref<128x16xbf16, #tpu.memory_space<vmem>>, %arg11: memref<1x16xf32, #tpu.memory_space<vmem>>, %arg12: memref<16x128xbf16, #tpu.memory_space<vmem>>, %arg13: memref<1x128xf32, #tpu.memory_space<vmem>>, %arg14: memref<128x128xbf16, #tpu.memory_space<vmem>>, %arg15: memref<128x128xbf16, #tpu.memory_space<vmem>>, %arg16: memref<128x128xbf16, #tpu.memory_space<vmem>>, %arg17: memref<1x128xf32, #tpu.memory_space<vmem>>, %arg18: memref<128x3xbf16, #tpu.memory_space<vmem>>, %arg19: memref<1x3xf32, #tpu.memory_space<vmem>>, %arg20: memref<128x16xbf16, #tpu.memory_space<vmem>>, %arg21: memref<1x16xf32, #tpu.memory_space<vmem>>, %arg22: memref<16x128xbf16, #tpu.memory_space<vmem>>, %arg23: memref<1x128xf32, #tpu.memory_space<vmem>>, %arg24: memref<8x128xf32, #tpu.memory_space<vmem>>) attributes {dimension_semantics = [#tpu.dimension_semantics<parallel>], iteration_bounds = array<i64: 2>, scalar_prefetch = 0 : i64, scratch_operands = 0 : i64, tpu.core_type = #tpu.core_type<tc>, window_params = [{transform_indices = @transform_0, window_bounds = array<i64: 8, 128>}, {pipeline_mode = #tpu.pipeline_mode<synchronous>, transform_indices = @transform_1, window_bounds = array<i64: 128, 16>}, {pipeline_mode = #tpu.pipeline_mode<synchronous>, transform_indices = @transform_2, window_bounds = array<i64: 1, 16>}, {pipeline_mode = #tpu.pipeline_mode<synchronous>, transform_indices = @transform_3, window_bounds = array<i64: 16, 128>}, {pipeline_mode = #tpu.pipeline_mode<synchronous>, transform_indices = @transform_4, window_bounds = array<i64: 1, 128>}, {pipeline_mode = #tpu.pipeline_mode<synchronous>, transform_indices = @transform_5, window_bounds = array<i64: 128, 16>}, {pipeline_mode = #tpu.pipeline_mode<synchronous>, transform_indices = @transform_6, window_bounds = array<i64: 1, 16>}, {pipeline_mode = #tpu.pipeline_mode<synchronous>, transform_indices = @transform_7, window_bounds = array<i64: 16, 128>}, {pipeline_mode = #tpu.pipeline_mode<synchronous>, transform_indices = @transform_8, window_bounds = array<i64: 1, 128>}, {pipeline_mode = #tpu.pipeline_mode<synchronous>, transform_indices = @transform_9, window_bounds = array<i64: 128, 16>}, {pipeline_mode = #tpu.pipeline_mode<synchronous>, transform_indices = @transform_10, window_bounds = array<i64: 1, 16>}, {pipeline_mode = #tpu.pipeline_mode<synchronous>, transform_indices = @transform_11, window_bounds = array<i64: 16, 128>}, {pipeline_mode = #tpu.pipeline_mode<synchronous>, transform_indices = @transform_12, window_bounds = array<i64: 1, 128>}, {pipeline_mode = #tpu.pipeline_mode<synchronous>, transform_indices = @transform_13, window_bounds = array<i64: 128, 128>}, {pipeline_mode = #tpu.pipeline_mode<synchronous>, transform_indices = @transform_14, window_bounds = array<i64: 128, 128>}, {pipeline_mode = #tpu.pipeline_mode<synchronous>, transform_indices = @transform_15, window_bounds = array<i64: 128, 128>}, {pipeline_mode = #tpu.pipeline_mode<synchronous>, transform_indices = @transform_16, window_bounds = array<i64: 1, 128>}, {pipeline_mode = #tpu.pipeline_mode<synchronous>, transform_indices = @transform_17, window_bounds = array<i64: 128, 3>}, {pipeline_mode = #tpu.pipeline_mode<synchronous>, transform_indices = @transform_18, window_bounds = array<i64: 1, 3>}, {pipeline_mode = #tpu.pipeline_mode<synchronous>, transform_indices = @transform_19, window_bounds = array<i64: 128, 16>}, {pipeline_mode = #tpu.pipeline_mode<synchronous>, transform_indices = @transform_20, window_bounds = array<i64: 1, 16>}, {pipeline_mode = #tpu.pipeline_mode<synchronous>, transform_indices = @transform_21, window_bounds = array<i64: 16, 128>}, {pipeline_mode = #tpu.pipeline_mode<synchronous>, transform_indices = @transform_22, window_bounds = array<i64: 1, 128>}, {transform_indices = @transform_23, window_bounds = array<i64: 8, 128>}]} {
    %c0 = arith.constant 0 : index
    %c0_0 = arith.constant 0 : index
    %0 = vector.load %arg1[%c0, %c0_0] : memref<8x128xf32, #tpu.memory_space<vmem>>, vector<8x128xf32>
    %1 = arith.truncf %0 : vector<8x128xf32> to vector<8x128xbf16>
    %c0_1 = arith.constant 0 : index
    %c0_2 = arith.constant 0 : index
    %2 = vector.load %arg2[%c0_1, %c0_2] : memref<128x16xbf16, #tpu.memory_space<vmem>>, vector<128x16xbf16>
    %cst = arith.constant dense<0.000000e+00> : vector<8x16xf32>
    %3 = tpu.matmul %1, %2, %cst {dimension_numbers = #tpu.dot_dimension_numbers<[1], [0], [0], [1], [0, 0, 1, 1], [], []>} : vector<8x128xbf16>, vector<128x16xbf16>, vector<8x16xf32> -> vector<8x16xf32>
    %c0_3 = arith.constant 0 : index
    %c0_4 = arith.constant 0 : index
    %4 = vector.load %arg3[%c0_3, %c0_4] : memref<1x16xf32, #tpu.memory_space<vmem>>, vector<1x16xf32>
    %5 = vector.broadcast %4 : vector<1x16xf32> to vector<8x16xf32>
    %6 = arith.addf %3, %5 : vector<8x16xf32>
    %cst_5 = arith.constant 0.000000e+00 : f32
    %7 = vector.broadcast %cst_5 : f32 to vector<8x16xf32>
    %8 = arith.maximumf %6, %7 : vector<8x16xf32>
    %9 = arith.truncf %8 : vector<8x16xf32> to vector<8x16xbf16>
    %c0_6 = arith.constant 0 : index
    %c0_7 = arith.constant 0 : index
    %10 = vector.load %arg4[%c0_6, %c0_7] : memref<16x128xbf16, #tpu.memory_space<vmem>>, vector<16x128xbf16>
    %cst_8 = arith.constant dense<0.000000e+00> : vector<8x128xf32>
    %11 = tpu.matmul %9, %10, %cst_8 {dimension_numbers = #tpu.dot_dimension_numbers<[1], [0], [0], [1], [0, 0, 1, 1], [], []>} : vector<8x16xbf16>, vector<16x128xbf16>, vector<8x128xf32> -> vector<8x128xf32>
    %c0_9 = arith.constant 0 : index
    %c0_10 = arith.constant 0 : index
    %12 = vector.load %arg5[%c0_9, %c0_10] : memref<1x128xf32, #tpu.memory_space<vmem>>, vector<1x128xf32>
    %13 = vector.broadcast %12 : vector<1x128xf32> to vector<8x128xf32>
    %14 = arith.addf %11, %13 : vector<8x128xf32>
    %c0_11 = arith.constant 0 : index
    %c0_12 = arith.constant 0 : index
    %15 = vector.load %arg6[%c0_11, %c0_12] : memref<128x16xbf16, #tpu.memory_space<vmem>>, vector<128x16xbf16>
    %cst_13 = arith.constant dense<0.000000e+00> : vector<8x16xf32>
    %16 = tpu.matmul %1, %15, %cst_13 {dimension_numbers = #tpu.dot_dimension_numbers<[1], [0], [0], [1], [0, 0, 1, 1], [], []>} : vector<8x128xbf16>, vector<128x16xbf16>, vector<8x16xf32> -> vector<8x16xf32>
    %c0_14 = arith.constant 0 : index
    %c0_15 = arith.constant 0 : index
    %17 = vector.load %arg7[%c0_14, %c0_15] : memref<1x16xf32, #tpu.memory_space<vmem>>, vector<1x16xf32>
    %18 = vector.broadcast %17 : vector<1x16xf32> to vector<8x16xf32>
    %19 = arith.addf %16, %18 : vector<8x16xf32>
    %cst_16 = arith.constant 0.000000e+00 : f32
    %20 = vector.broadcast %cst_16 : f32 to vector<8x16xf32>
    %21 = arith.maximumf %19, %20 : vector<8x16xf32>
    %22 = arith.truncf %21 : vector<8x16xf32> to vector<8x16xbf16>
    %c0_17 = arith.constant 0 : index
    %c0_18 = arith.constant 0 : index
    %23 = vector.load %arg8[%c0_17, %c0_18] : memref<16x128xbf16, #tpu.memory_space<vmem>>, vector<16x128xbf16>
    %cst_19 = arith.constant dense<0.000000e+00> : vector<8x128xf32>
    %24 = tpu.matmul %22, %23, %cst_19 {dimension_numbers = #tpu.dot_dimension_numbers<[1], [0], [0], [1], [0, 0, 1, 1], [], []>} : vector<8x16xbf16>, vector<16x128xbf16>, vector<8x128xf32> -> vector<8x128xf32>
    %c0_20 = arith.constant 0 : index
    %c0_21 = arith.constant 0 : index
    %25 = vector.load %arg9[%c0_20, %c0_21] : memref<1x128xf32, #tpu.memory_space<vmem>>, vector<1x128xf32>
    %26 = vector.broadcast %25 : vector<1x128xf32> to vector<8x128xf32>
    %27 = arith.addf %24, %26 : vector<8x128xf32>
    %c0_22 = arith.constant 0 : index
    %c0_23 = arith.constant 0 : index
    %28 = vector.load %arg10[%c0_22, %c0_23] : memref<128x16xbf16, #tpu.memory_space<vmem>>, vector<128x16xbf16>
    %cst_24 = arith.constant dense<0.000000e+00> : vector<8x16xf32>
    %29 = tpu.matmul %1, %28, %cst_24 {dimension_numbers = #tpu.dot_dimension_numbers<[1], [0], [0], [1], [0, 0, 1, 1], [], []>} : vector<8x128xbf16>, vector<128x16xbf16>, vector<8x16xf32> -> vector<8x16xf32>
    %c0_25 = arith.constant 0 : index
    %c0_26 = arith.constant 0 : index
    %30 = vector.load %arg11[%c0_25, %c0_26] : memref<1x16xf32, #tpu.memory_space<vmem>>, vector<1x16xf32>
    %31 = vector.broadcast %30 : vector<1x16xf32> to vector<8x16xf32>
    %32 = arith.addf %29, %31 : vector<8x16xf32>
    %cst_27 = arith.constant 0.000000e+00 : f32
    %33 = vector.broadcast %cst_27 : f32 to vector<8x16xf32>
    %34 = arith.maximumf %32, %33 : vector<8x16xf32>
    %35 = arith.truncf %34 : vector<8x16xf32> to vector<8x16xbf16>
    %c0_28 = arith.constant 0 : index
    %c0_29 = arith.constant 0 : index
    %36 = vector.load %arg12[%c0_28, %c0_29] : memref<16x128xbf16, #tpu.memory_space<vmem>>, vector<16x128xbf16>
    %cst_30 = arith.constant dense<0.000000e+00> : vector<8x128xf32>
    %37 = tpu.matmul %35, %36, %cst_30 {dimension_numbers = #tpu.dot_dimension_numbers<[1], [0], [0], [1], [0, 0, 1, 1], [], []>} : vector<8x16xbf16>, vector<16x128xbf16>, vector<8x128xf32> -> vector<8x128xf32>
    %c0_31 = arith.constant 0 : index
    %c0_32 = arith.constant 0 : index
    %38 = vector.load %arg13[%c0_31, %c0_32] : memref<1x128xf32, #tpu.memory_space<vmem>>, vector<1x128xf32>
    %39 = vector.broadcast %38 : vector<1x128xf32> to vector<8x128xf32>
    %40 = arith.addf %37, %39 : vector<8x128xf32>
    %c0_33 = arith.constant 0 : index
    %c0_34 = arith.constant 0 : index
    %41 = vector.load %arg17[%c0_33, %c0_34] : memref<1x128xf32, #tpu.memory_space<vmem>>, vector<1x128xf32>
    %42 = arith.truncf %14 : vector<8x128xf32> to vector<8x128xbf16>
    %c0_35 = arith.constant 0 : index
    %c0_36 = arith.constant 0 : index
    %43 = vector.load %arg14[%c0_35, %c0_36] : memref<128x128xbf16, #tpu.memory_space<vmem>>, vector<128x128xbf16>
    %cst_37 = arith.constant dense<0.000000e+00> : vector<8x128xf32>
    %44 = tpu.matmul %42, %43, %cst_37 {dimension_numbers = #tpu.dot_dimension_numbers<[1], [0], [0], [1], [0, 0, 1, 1], [], []>} : vector<8x128xbf16>, vector<128x128xbf16>, vector<8x128xf32> -> vector<8x128xf32>
    %45 = vector.broadcast %41 : vector<1x128xf32> to vector<8x128xf32>
    %46 = arith.addf %45, %44 : vector<8x128xf32>
    %47 = arith.truncf %27 : vector<8x128xf32> to vector<8x128xbf16>
    %c0_38 = arith.constant 0 : index
    %c0_39 = arith.constant 0 : index
    %48 = vector.load %arg15[%c0_38, %c0_39] : memref<128x128xbf16, #tpu.memory_space<vmem>>, vector<128x128xbf16>
    %cst_40 = arith.constant dense<0.000000e+00> : vector<8x128xf32>
    %49 = tpu.matmul %47, %48, %cst_40 {dimension_numbers = #tpu.dot_dimension_numbers<[1], [0], [0], [1], [0, 0, 1, 1], [], []>} : vector<8x128xbf16>, vector<128x128xbf16>, vector<8x128xf32> -> vector<8x128xf32>
    %50 = arith.addf %46, %49 : vector<8x128xf32>
    %51 = arith.truncf %40 : vector<8x128xf32> to vector<8x128xbf16>
    %c0_41 = arith.constant 0 : index
    %c0_42 = arith.constant 0 : index
    %52 = vector.load %arg16[%c0_41, %c0_42] : memref<128x128xbf16, #tpu.memory_space<vmem>>, vector<128x128xbf16>
    %cst_43 = arith.constant dense<0.000000e+00> : vector<8x128xf32>
    %53 = tpu.matmul %51, %52, %cst_43 {dimension_numbers = #tpu.dot_dimension_numbers<[1], [0], [0], [1], [0, 0, 1, 1], [], []>} : vector<8x128xbf16>, vector<128x128xbf16>, vector<8x128xf32> -> vector<8x128xf32>
    %54 = arith.addf %50, %53 : vector<8x128xf32>
    %cst_44 = arith.constant 0.000000e+00 : f32
    %55 = vector.broadcast %cst_44 : f32 to vector<8x128xf32>
    %56 = arith.maximumf %54, %55 : vector<8x128xf32>
    %57 = arith.truncf %56 : vector<8x128xf32> to vector<8x128xbf16>
    %c0_45 = arith.constant 0 : index
    %c0_46 = arith.constant 0 : index
    %58 = vector.load %arg18[%c0_45, %c0_46] : memref<128x3xbf16, #tpu.memory_space<vmem>>, vector<128x3xbf16>
    %cst_47 = arith.constant dense<0.000000e+00> : vector<8x3xf32>
    %59 = tpu.matmul %57, %58, %cst_47 {dimension_numbers = #tpu.dot_dimension_numbers<[1], [0], [0], [1], [0, 0, 1, 1], [], []>} : vector<8x128xbf16>, vector<128x3xbf16>, vector<8x3xf32> -> vector<8x3xf32>
    %c0_48 = arith.constant 0 : index
    %c0_49 = arith.constant 0 : index
    %60 = vector.load %arg19[%c0_48, %c0_49] : memref<1x3xf32, #tpu.memory_space<vmem>>, vector<1x3xf32>
    %61 = vector.broadcast %60 : vector<1x3xf32> to vector<8x3xf32>
    %62 = arith.addf %59, %61 : vector<8x3xf32>
    %cst_50 = arith.constant dense<0xFF800000> : vector<8xf32>
    %63 = vector.multi_reduction <maximumf>, %62, %cst_50 [1] : vector<8x3xf32> to vector<8xf32>
    %64 = vector.shape_cast %63 : vector<8xf32> to vector<8x1xf32>
    %65 = vector.broadcast %64 : vector<8x1xf32> to vector<8x3xf32>
    %66 = arith.subf %62, %65 : vector<8x3xf32>
    %67 = math.exp %66 : vector<8x3xf32>
    %cst_51 = arith.constant dense<0.000000e+00> : vector<8xf32>
    %68 = vector.multi_reduction <add>, %67, %cst_51 [1] : vector<8x3xf32> to vector<8xf32>
    %69 = vector.shape_cast %68 : vector<8xf32> to vector<8x1xf32>
    %70 = tpu.reciprocal %69 {approx = true} : vector<8x1xf32> -> vector<8x1xf32>
    %71 = vector.broadcast %70 : vector<8x1xf32> to vector<8x3xf32>
    %72 = arith.mulf %67, %71 : vector<8x3xf32>
    %73 = vector.extract_strided_slice %72 {offsets = [0, 0], sizes = [8, 1], strides = [1, 1]} : vector<8x3xf32> to vector<8x1xf32>
    %74 = vector.broadcast %73 : vector<8x1xf32> to vector<8x128xf32>
    %75 = arith.mulf %14, %74 : vector<8x128xf32>
    %76 = vector.extract_strided_slice %72 {offsets = [0, 1], sizes = [8, 1], strides = [1, 1]} : vector<8x3xf32> to vector<8x1xf32>
    %77 = vector.broadcast %76 : vector<8x1xf32> to vector<8x128xf32>
    %78 = arith.mulf %27, %77 : vector<8x128xf32>
    %79 = arith.addf %75, %78 : vector<8x128xf32>
    %80 = vector.extract_strided_slice %72 {offsets = [0, 2], sizes = [8, 1], strides = [1, 1]} : vector<8x3xf32> to vector<8x1xf32>
    %81 = vector.broadcast %80 : vector<8x1xf32> to vector<8x128xf32>
    %82 = arith.mulf %40, %81 : vector<8x128xf32>
    %83 = arith.addf %79, %82 : vector<8x128xf32>
    %84 = arith.truncf %83 : vector<8x128xf32> to vector<8x128xbf16>
    %c0_52 = arith.constant 0 : index
    %c0_53 = arith.constant 0 : index
    %85 = vector.load %arg20[%c0_52, %c0_53] : memref<128x16xbf16, #tpu.memory_space<vmem>>, vector<128x16xbf16>
    %cst_54 = arith.constant dense<0.000000e+00> : vector<8x16xf32>
    %86 = tpu.matmul %84, %85, %cst_54 {dimension_numbers = #tpu.dot_dimension_numbers<[1], [0], [0], [1], [0, 0, 1, 1], [], []>} : vector<8x128xbf16>, vector<128x16xbf16>, vector<8x16xf32> -> vector<8x16xf32>
    %c0_55 = arith.constant 0 : index
    %c0_56 = arith.constant 0 : index
    %87 = vector.load %arg21[%c0_55, %c0_56] : memref<1x16xf32, #tpu.memory_space<vmem>>, vector<1x16xf32>
    %88 = vector.broadcast %87 : vector<1x16xf32> to vector<8x16xf32>
    %89 = arith.addf %86, %88 : vector<8x16xf32>
    %cst_57 = arith.constant 0.000000e+00 : f32
    %90 = vector.broadcast %cst_57 : f32 to vector<8x16xf32>
    %91 = arith.maximumf %89, %90 : vector<8x16xf32>
    %92 = arith.truncf %91 : vector<8x16xf32> to vector<8x16xbf16>
    %c0_58 = arith.constant 0 : index
    %c0_59 = arith.constant 0 : index
    %93 = vector.load %arg22[%c0_58, %c0_59] : memref<16x128xbf16, #tpu.memory_space<vmem>>, vector<16x128xbf16>
    %cst_60 = arith.constant dense<0.000000e+00> : vector<8x128xf32>
    %94 = tpu.matmul %92, %93, %cst_60 {dimension_numbers = #tpu.dot_dimension_numbers<[1], [0], [0], [1], [0, 0, 1, 1], [], []>} : vector<8x16xbf16>, vector<16x128xbf16>, vector<8x128xf32> -> vector<8x128xf32>
    %c0_61 = arith.constant 0 : index
    %c0_62 = arith.constant 0 : index
    %95 = vector.load %arg23[%c0_61, %c0_62] : memref<1x128xf32, #tpu.memory_space<vmem>>, vector<1x128xf32>
    %96 = vector.broadcast %95 : vector<1x128xf32> to vector<8x128xf32>
    %97 = arith.addf %94, %96 : vector<8x128xf32>
    %98 = arith.addf %97, %0 : vector<8x128xf32>
    %c0_63 = arith.constant 0 : index
    %c0_64 = arith.constant 0 : index
    %99 = vector.load %arg24[%c0_63, %c0_64] : memref<8x128xf32, #tpu.memory_space<vmem>>, vector<8x128xf32>
    tpu.vector_store %arg24[%c0_63, %c0_64], %98 {strides = array<i32>} : memref<8x128xf32, #tpu.memory_space<vmem>>, vector<8x128xf32>,
    return
  }
  func.func @transform_0(%arg0: i32) -> (i32, i32) {
    %c0_i32 = arith.constant 0 : i32
    %c0_i32_0 = arith.constant 0 : i32
    return %arg0, %c0_i32 : i32, i32
  }
  func.func @transform_1(%arg0: i32) -> (i32, i32) {
    %c0_i32 = arith.constant 0 : i32
    %c0_i32_0 = arith.constant 0 : i32
    %c0_i32_1 = arith.constant 0 : i32
    return %c0_i32, %c0_i32_0 : i32, i32
  }
  func.func @transform_2(%arg0: i32) -> (i32, i32) {
    %c0_i32 = arith.constant 0 : i32
    %c0_i32_0 = arith.constant 0 : i32
    %c0_i32_1 = arith.constant 0 : i32
    return %c0_i32, %c0_i32_0 : i32, i32
  }
  func.func @transform_3(%arg0: i32) -> (i32, i32) {
    %c0_i32 = arith.constant 0 : i32
    %c0_i32_0 = arith.constant 0 : i32
    %c0_i32_1 = arith.constant 0 : i32
    return %c0_i32, %c0_i32_0 : i32, i32
  }
  func.func @transform_4(%arg0: i32) -> (i32, i32) {
    %c0_i32 = arith.constant 0 : i32
    %c0_i32_0 = arith.constant 0 : i32
    %c0_i32_1 = arith.constant 0 : i32
    return %c0_i32, %c0_i32_0 : i32, i32
  }
  func.func @transform_5(%arg0: i32) -> (i32, i32) {
    %c0_i32 = arith.constant 0 : i32
    %c0_i32_0 = arith.constant 0 : i32
    %c0_i32_1 = arith.constant 0 : i32
    return %c0_i32, %c0_i32_0 : i32, i32
  }
  func.func @transform_6(%arg0: i32) -> (i32, i32) {
    %c0_i32 = arith.constant 0 : i32
    %c0_i32_0 = arith.constant 0 : i32
    %c0_i32_1 = arith.constant 0 : i32
    return %c0_i32, %c0_i32_0 : i32, i32
  }
  func.func @transform_7(%arg0: i32) -> (i32, i32) {
    %c0_i32 = arith.constant 0 : i32
    %c0_i32_0 = arith.constant 0 : i32
    %c0_i32_1 = arith.constant 0 : i32
    return %c0_i32, %c0_i32_0 : i32, i32
  }
  func.func @transform_8(%arg0: i32) -> (i32, i32) {
    %c0_i32 = arith.constant 0 : i32
    %c0_i32_0 = arith.constant 0 : i32
    %c0_i32_1 = arith.constant 0 : i32
    return %c0_i32, %c0_i32_0 : i32, i32
  }
  func.func @transform_9(%arg0: i32) -> (i32, i32) {
    %c0_i32 = arith.constant 0 : i32
    %c0_i32_0 = arith.constant 0 : i32
    %c0_i32_1 = arith.constant 0 : i32
    return %c0_i32, %c0_i32_0 : i32, i32
  }
  func.func @transform_10(%arg0: i32) -> (i32, i32) {
    %c0_i32 = arith.constant 0 : i32
    %c0_i32_0 = arith.constant 0 : i32
    %c0_i32_1 = arith.constant 0 : i32
    return %c0_i32, %c0_i32_0 : i32, i32
  }
  func.func @transform_11(%arg0: i32) -> (i32, i32) {
    %c0_i32 = arith.constant 0 : i32
    %c0_i32_0 = arith.constant 0 : i32
    %c0_i32_1 = arith.constant 0 : i32
    return %c0_i32, %c0_i32_0 : i32, i32
  }
  func.func @transform_12(%arg0: i32) -> (i32, i32) {
    %c0_i32 = arith.constant 0 : i32
    %c0_i32_0 = arith.constant 0 : i32
    %c0_i32_1 = arith.constant 0 : i32
    return %c0_i32, %c0_i32_0 : i32, i32
  }
  func.func @transform_13(%arg0: i32) -> (i32, i32) {
    %c0_i32 = arith.constant 0 : i32
    %c0_i32_0 = arith.constant 0 : i32
    %c0_i32_1 = arith.constant 0 : i32
    return %c0_i32, %c0_i32_0 : i32, i32
  }
  func.func @transform_14(%arg0: i32) -> (i32, i32) {
    %c0_i32 = arith.constant 0 : i32
    %c0_i32_0 = arith.constant 0 : i32
    %c0_i32_1 = arith.constant 0 : i32
    return %c0_i32, %c0_i32_0 : i32, i32
  }
  func.func @transform_15(%arg0: i32) -> (i32, i32) {
    %c0_i32 = arith.constant 0 : i32
    %c0_i32_0 = arith.constant 0 : i32
    %c0_i32_1 = arith.constant 0 : i32
    return %c0_i32, %c0_i32_0 : i32, i32
  }
  func.func @transform_16(%arg0: i32) -> (i32, i32) {
    %c0_i32 = arith.constant 0 : i32
    %c0_i32_0 = arith.constant 0 : i32
    %c0_i32_1 = arith.constant 0 : i32
    return %c0_i32, %c0_i32_0 : i32, i32
  }
  func.func @transform_17(%arg0: i32) -> (i32, i32) {
    %c0_i32 = arith.constant 0 : i32
    %c0_i32_0 = arith.constant 0 : i32
    %c0_i32_1 = arith.constant 0 : i32
    return %c0_i32, %c0_i32_0 : i32, i32
  }
  func.func @transform_18(%arg0: i32) -> (i32, i32) {
    %c0_i32 = arith.constant 0 : i32
    %c0_i32_0 = arith.constant 0 : i32
    %c0_i32_1 = arith.constant 0 : i32
    return %c0_i32, %c0_i32_0 : i32, i32
  }
  func.func @transform_19(%arg0: i32) -> (i32, i32) {
    %c0_i32 = arith.constant 0 : i32
    %c0_i32_0 = arith.constant 0 : i32
    %c0_i32_1 = arith.constant 0 : i32
    return %c0_i32, %c0_i32_0 : i32, i32
  }
  func.func @transform_20(%arg0: i32) -> (i32, i32) {
    %c0_i32 = arith.constant 0 : i32
    %c0_i32_0 = arith.constant 0 : i32
    %c0_i32_1 = arith.constant 0 : i32
    return %c0_i32, %c0_i32_0 : i32, i32
  }
  func.func @transform_21(%arg0: i32) -> (i32, i32) {
    %c0_i32 = arith.constant 0 : i32
    %c0_i32_0 = arith.constant 0 : i32
    %c0_i32_1 = arith.constant 0 : i32
    return %c0_i32, %c0_i32_0 : i32, i32
  }
  func.func @transform_22(%arg0: i32) -> (i32, i32) {
    %c0_i32 = arith.constant 0 : i32
    %c0_i32_0 = arith.constant 0 : i32
    %c0_i32_1 = arith.constant 0 : i32
    return %c0_i32, %c0_i32_0 : i32, i32
  }
  func.func @transform_23(%arg0: i32) -> (i32, i32) {
    %c0_i32 = arith.constant 0 : i32
    %c0_i32_0 = arith.constant 0 : i32
    return %arg0, %c0_i32 : i32, i32
  }
}

</mosaic_0001>

<bundles_post_ra>
// kernel: _msi_pallas.1
= control target key start
LH: loop header
LB: loop body
LE: loop exit
PB: predicated region body
PF: predicated region fallthrough
CT: control target
= control target key end

     0   :  { %s3055_s0 = inlined_call_operand.vmem [shape: f32[16,128], index: 0, kind: input, shape index: {}]   ;;  %s3056_s1 = inlined_call_operand.vmem [shape: bf16[128,16], index: 1, kind: input, shape index: {}]   ;;  %s3057_s2 = inlined_call_operand.vmem [shape: f32[1,16], index: 2, kind: input, shape index: {}]   ;;  %s3058_s3 = inlined_call_operand.vmem [shape: bf16[16,128], index: 3, kind: input, shape index: {}]   ;;  %s3059_s4 = inlined_call_operand.vmem [shape: f32[1,128], index: 4, kind: input, shape index: {}]   ;;  %s3060_s5 = inlined_call_operand.vmem [shape: bf16[128,16], index: 5, kind: input, shape index: {}]   ;;  %s3061_s6 = inlined_call_operand.vmem [shape: f32[1,16], index: 6, kind: input, shape index: {}]   ;;  %s3062_s7 = inlined_call_operand.vmem [shape: bf16[16,128], index: 7, kind: input, shape index: {}]   ;;  %s3063_s8 = inlined_call_operand.vmem [shape: f32[1,128], index: 8, kind: input, shape index: {}]   ;;  %s3064_s9 = inlined_call_operand.vmem [shape: bf16[128,16], index: 9, kind: input, shape index: {}]   ;;  %s3065_s10 = inlined_call_operand.vmem [shape: f32[1,16], index: 10, kind: input, shape index: {}]   ;;  %s3066_s11 = inlined_call_operand.vmem [shape: bf16[16,128], index: 11, kind: input, shape index: {}]   ;;  %s3067_s12 = inlined_call_operand.vmem [shape: f32[1,128], index: 12, kind: input, shape index: {}]   ;;  %s3068_s13 = inlined_call_operand.vmem [shape: bf16[128,128], index: 13, kind: input, shape index: {}]   ;;  %s3069_s14 = inlined_call_operand.vmem [shape: bf16[128,128], index: 14, kind: input, shape index: {}]   ;;  %s3070_s15 = inlined_call_operand.vmem [shape: bf16[128,128], index: 15, kind: input, shape index: {}]   ;;  %s3071_s16 = inlined_call_operand.vmem [shape: f32[1,128], index: 16, kind: input, shape index: {}]   ;;  %s3072_s17 = inlined_call_operand.vmem [shape: bf16[128,3], index: 17, kind: input, shape index: {}]   ;;  %s3073_s18 = inlined_call_operand.vmem [shape: f32[1,3], index: 18, kind: input, shape index: {}]   ;;  %s3074_s19 = inlined_call_operand.vmem [shape: bf16[128,16], index: 19, kind: input, shape index: {}]   ;;  %s3075_s20 = inlined_call_operand.vmem [shape: f32[1,16], index: 20, kind: input, shape index: {}]   ;;  %s3076_s21 = inlined_call_operand.vmem [shape: bf16[16,128], index: 21, kind: input, shape index: {}]   ;;  %s3077_s22 = inlined_call_operand.vmem [shape: f32[1,128], index: 22, kind: input, shape index: {}]   ;;  %s3078_s23 = inlined_call_operand.hbm [shape: f32[16,128], index: 23, kind: output, shape index: {}]  }
   0x1   :  { %3088 = sst [smem:[#allocation11_spill]] %s3055_s0 }
   0x2   :  { %3089 = sst [smem:[#allocation12_spill]] %s3056_s1 }
   0x3   :  { %3090 = sst [smem:[#allocation13_spill]] %s3057_s2 }
   0x4   :  { %3091 = sst [smem:[#allocation14_spill]] %s3058_s3 }
   0x5   :  { %3092 = sst [smem:[#allocation15_spill]] %s3059_s4 }
   0x6   :  { %3093 = sst [smem:[#allocation16_spill]] %s3060_s5 }
   0x7   :  { %3094 = sst [smem:[#allocation17_spill]] %s3061_s6 }
   0x8   :  { %3095 = sst [smem:[#allocation18_spill]] %s3062_s7 }
   0x9   :  { %28 = vsyncpa [#allocation3], 0 }
   0xa   :  { %30 = vsyncpa [#allocation3 + $0x1], 0  ;;  %s2601_s4 = smov 0   ;;  %s2603_s30 = smov 0  }
   0xb   :  { %s2605_s24 = smov 0   ;;  %s2607_s25 = smov 0  }
   0xc LB: > { %3096 = sst [smem:[#allocation5_spill]] %s2461_s4  ;;  %s2622_s5 = sadd.s32 4294967295, %s2473_s25   ;;  %s2473_s25 = sphi %s2607_s25, %s3115_s25   ;;  %s2469_s24 = sphi %s2605_s24, %s3117_s24   ;;  %s2465_s30 = sphi %s2603_s30, %s3119_s30   ;;  %s2461_s4 = sphi %s2601_s4, %s3118_s4  }
   0xd   : > { %3097 = sst [smem:[#allocation6_spill]] %s2469_s24  ;;  %s1938_s1 = sadd.s32 4294967294, %s2473_s25  }
   0xe   : > { %3098 = sst [smem:[#allocation7_spill]] %s2473_s25  ;;  %s2626_s26 = sadd.s32 1, %s2473_s25  }
   0xf   : > { %3099 = sst [smem:[#allocation8_spill]] %s2626_s26  ;;  %s531_s2 = sadd.s32 1, %s2469_s24 }
  0x10   : > { %s528_s6 = ssub.s32 %s2473_s25, %s2626_s26  ;;  %p541_p0 = scmp.ne.s32.totalorder %s2469_s24, %s2465_s30 }
  0x11   : > { %p529_p1 = scmp.eq.s32.totalorder %s528_s6, 0  ;;  %p542_p2 = scmp.eq.s32.totalorder %s2622_s5, 1 }
  0x12   : > { %p547_p3 = scmp.ne.s32.totalorder %s2465_s30, %s2461_s4  ;;  %p548_p4 = scmp.eq.s32.totalorder %s1938_s1, 1 }
  0x13   : > { %s2637_s27 = scalar_select %p529_p1, %s2469_s24, %s531_s2  }
  0x14   : > { %p2639_p5 = por %p542_p2, %p541_p0  ;;  %p2643_p6 = por %p548_p4, %p547_p3 }
  0x15   : > { %3100 = sst [smem:[#allocation9_spill]] %s2637_s27  ;;  %p1941_p7 = scmp.ge.s32.totalorder %s2473_s25, 1 }
  0x16   : > { %s3102_s28 = scalar_select %p2643_p6, 1, 0 }
  0x17   : > { %p639_p8 = scmp.lt.s32.totalorder %s2473_s25, 3 }
  0x18   : > { %3103 = sst [smem:[#allocation10_spill]] %s3102_s28 }
  0x19   : > { %p640_p9 = pnand %p1941_p7, %p639_p8 }
  0x1a   : > { %s3104_s0 = sld [smem:[#allocation12_spill]] (!%p640_p9)  ;;  %p702_p10 = scmp.lt.s32.totalorder (!%p640_p9), %s2622_s5, 1 }
  0x1b   : > { %643 = sbr.rel (%p640_p9) target bundleno = 1977 (0x7b9), region = 112  ;;  %s3105_s4 = sld [smem:[#allocation11_spill]] (!%p640_p9) }
  0x1c   : > { %s3106_s28 = sld [smem:[#allocation14_spill]] (!%p640_p9) }
  0x1d   : > { %s3107_s3 = sld [smem:[#allocation13_spill]] (!%p640_p9) }
  0x1e   : > { %s3108_s2 = sld [smem:[#allocation16_spill]] (!%p640_p9) }
  0x1f   : > { %s3111_s24 = sld [smem:[#allocation15_spill]] (!%p640_p9) }
  0x20   : > { %v2341_v0 = vld [vmem:[%s3104_s0 + $0x38] sm:$0xff]   ;;  %v2475_v1 = vmov 0.0   ;;  %v2342_v2 = vld [vmem:[%s3104_s0 + $0x30] sm:$0xff]   ;;  %vm2476_vm0 = vmmov 0   ;;  %s703_s6 = scalar_select %p702_p10, %s2622_s5, 1  ;;  %v2343_v3 = vld [vmem:[%s3104_s0 + $0x28] sm:$0xff]  }
  0x21   : > { %2110 = vmatprep.subr.bf16.mxu0 %v2475_v1  ;;  %2130 = vmatprep.subr.bf16.mxu1 %v2475_v1  ;;  %v2344_v4 = vld [vmem:[%s3104_s0 + $0x20] sm:$0xff]   ;;  %v2345_v5 = vld [vmem:[%s3104_s0 + $0x18] sm:$0xff]   ;;  %v2346_v6 = vld [vmem:[%s3104_s0 + $0x10] sm:$0xff]   ;;  %vm837_vm1 = vcmask 130048   ;;  %vm1661_vm2 = vcmask 23552  }
  0x22   : > { %2111 = vmatpush3.bf16.msra.mxu0 %v2341_v0  ;;  %2126 = vmatprep.mubr.msk.bf16.mxu0 %vm2476_vm0, %v2475_v1  ;;  %s1943_s27 = sshll.u32 %s703_s6, 3  ;;  %v2347_v7 = vld [vmem:[%s3104_s0 + $0x8] sm:$0xff]   ;;  %v2348_v8 = vld [vmem:[%s3104_s0] sm:$0xff]   ;;  %v2358_v28 = vld [vmem:[%s3064_s9 + $0x38] sm:$0xff]   ;;  %s3110_s6 = sld [smem:[#allocation17_spill]] }
  0x23   : > { %2112 = vmatprep.subr.bf16.mxu0 %v2475_v1  ;;  %2132 = vmatprep.mubr.msk.bf16.mxu1 %vm2476_vm0, %v2475_v1  ;;  %s705_s25 = scalar_lea.vmem %s3105_s4, %s1943_s27  ;;  %v2349_v11 = vld [vmem:[%s3106_s28] sm:$0xff]   ;;  %v2359_v29 = vld [vmem:[%s3064_s9 + $0x30] sm:$0xff]   ;;  %v2360_v30 = vld [vmem:[%s3064_s9 + $0x28] sm:$0xff]   ;;  %s3109_s4 = sld [smem:[#allocation18_spill]] }
  0x24   : > { %v2690_v9 = vld [vmem:[%s705_s25] sm:$0xff]  ;;  %2131 = vmatpush3.bf16.msra.mxu1 %v2349_v11  ;;  %v2350_v18 = vld [vmem:[%s3108_s2 + $0x38] sm:$0xff]   ;;  %v2351_v21 = vld [vmem:[%s3108_s2 + $0x30] sm:$0xff]   ;;  %s699_s25 = sand.u32 1, %s2465_s30  }
  0x25   : > { %v2695_v10 = vpack.c.bf16 %v2690_v9, %v2690_v9  ;;  %2136 = vmatprep.subr.bf16.mxu1 %v2475_v1  ;;  %v1944_v12 = vld [vmem:[%s3107_s3] ss:$0 sm:$0xff]  ;;  %v2352_v22 = vld [vmem:[%s3108_s2 + $0x28] sm:$0xff]   ;;  %v2354_v24 = vld [vmem:[%s3108_s2 + $0x18] sm:$0xff]   ;;  %s1942_s29 = sshll.u32 %s699_s25, 3  ;;  %s2480_s3 = smov [#allocation2]  }
  0x26   : > { %2113 = vmatpush3.bf16.msra.mxu0 %v2342_v2  ;;  %v2353_v23 = vld [vmem:[%s3108_s2 + $0x20] sm:$0xff]   ;;  %v2355_v25 = vld [vmem:[%s3108_s2 + $0x10] sm:$0xff]   ;;  %v2356_v26 = vld [vmem:[%s3108_s2 + $0x8] sm:$0xff]   ;;  %s2417_s1 = sshll.u32 %s2480_s3, 4  ;;  %s2418_s1 = int_to_ptr.vmem [resolvable:$false] %s2417_s1 }
  0x27   : > { %2114 = vmatprep.subr.bf16.mxu0 %v2475_v1  ;;  %v2357_v27 = vld [vmem:[%s3108_s2] sm:$0xff]   ;;  %v2362_v32 = vld [vmem:[%s3064_s9 + $0x18] sm:$0xff]   ;;  %v2363_v33 = vld [vmem:[%s3064_s9 + $0x10] sm:$0xff]  }
  0x28   : > { %v2361_v31 = vld [vmem:[%s3064_s9 + $0x20] sm:$0xff]   ;;  %v2364_v34 = vld [vmem:[%s3064_s9 + $0x8] sm:$0xff]   ;;  %v2376_v37 = vld [vmem:[%s3069_s14 + $0x38] sm:$0xff]  }
  0x29   : > { %v2365_v35 = vld [vmem:[%s3064_s9] sm:$0xff]   ;;  %v2377_v38 = vld [vmem:[%s3069_s14 + $0x30] sm:$0xff]   ;;  %v2378_v39 = vld [vmem:[%s3069_s14 + $0x28] sm:$0xff]  }
  0x2a   : > { %2115 = vmatpush3.bf16.msra.mxu0 %v2343_v3  ;;  %v2366_v36 = vld [vmem:[%s3109_s4] sm:$0xff]   ;;  %v2380_v41 = vld [vmem:[%s3069_s14 + $0x18] sm:$0xff]   ;;  %v2381_v42 = vld [vmem:[%s3069_s14 + $0x10] sm:$0xff]   ;;  %s2419_s4 = scalar_lea.vmem %s2418_s1, 256 }
  0x2b   : > { %2116 = vmatprep.subr.bf16.mxu0 %v2475_v1  ;;  %v2379_v40 = vld [vmem:[%s3069_s14 + $0x20] sm:$0xff]   ;;  %v2382_v43 = vld [vmem:[%s3069_s14 + $0x8] sm:$0xff]   ;;  %v2368_v63 = vld [vmem:[%s3068_s13 + $0x38] sm:$0xff]  }
  0x2c   : > { %v1956_v48 = vld [vmem:[%s3110_s6] ss:$0 sm:$0xff]  ;;  %v2369_v3 = vld [vmem:[%s3068_s13 + $0x30] sm:$0xff]   ;;  %s2027_s6 = sshll.u32 %s2622_s5, 7  ;;  %s1866_s5 = scalar_lea.sflag [#allocation3], %s699_s25 }
  0x2d   : > { %v2367_v54 = vld [vmem:[%s3066_s11] sm:$0xff]   ;;  %s3014_s28 = scalar_lea.hbm %s3078_s23, %s2027_s6 }
  0x2e   : > { %2117 = vmatpush3.bf16.msra.mxu0 %v2344_v4  ;;  %v1968_v57 = vld [vmem:[%s3065_s10] ss:$0 sm:$0xff]  ;;  %v2370_v4 = vld [vmem:[%s3068_s13 + $0x28] sm:$0xff]  }
  0x2f   : > { %2118 = vmatprep.subr.bf16.mxu0 %v2475_v1  ;;  %v2375_v11 = vld [vmem:[%s3068_s13] sm:$0xff]  }
  0x32   : > { %2119 = vmatpush3.bf16.msra.mxu0 %v2345_v5  ;;  %v2371_v5 = vld [vmem:[%s3068_s13 + $0x20] sm:$0xff]  }
  0x33   : > { %2120 = vmatprep.subr.bf16.mxu0 %v2475_v1 }
  0x36   : > { %2121 = vmatpush3.bf16.msra.mxu0 %v2346_v6  ;;  %v2372_v6 = vld [vmem:[%s3068_s13 + $0x18] sm:$0xff]  }
  0x37   : > { %2122 = vmatprep.subr.bf16.mxu0 %v2475_v1 }
  0x3a   : > { %2123 = vmatpush3.bf16.msra.mxu0 %v2347_v7  ;;  %v2373_v7 = vld [vmem:[%s3068_s13 + $0x10] sm:$0xff]  }
  0x3b   : > { %2124 = vmatprep.subr.bf16.mxu0 %v2475_v1 }
  0x3e   : > { %2125 = vmatpush3.bf16.msra.mxu0 %v2348_v8  ;;  %v2374_v8 = vld [vmem:[%s3068_s13 + $0x8] sm:$0xff]  }
  0x3f   : > { %2156 = vmatprep.subr.bf16.mxu0 %v2475_v1 }
  0x41   : > { %2127 = vmatmul.mubr.bf16.vlgmr.msra.gmra.mxu0 %v2695_v10 }
  0x42   : > { %2158 = vmatprep.mubr.msk.bf16.mxu0 %vm2476_vm0, %v2475_v1  ;;  %2157 = vmatpush3.bf16.msra.mxu0 %v2366_v36 }
  0x43   : > { %2182 = vmatprep.subr.bf16.mxu0 %v2475_v1 }
 0x101   : > { %v814_v13 = vpop.f32.mrf.mxu0 }
 0x102   : > { %v815_v14 = vadd.f32 %v1944_v12, %v814_v13 }
 0x103   : > { %v2128_v15 = vpop.f32.mrf.mxu0 }
 0x104   : > { %v820_v16 = vmax.f32 %v815_v14, 0.0  ;;  %v2383_v14 = vld [vmem:[%s3069_s14] sm:$0xff]   ;;  %v2384_v15 = vld [vmem:[%s3070_s15 + $0x38] sm:$0xff]  }
 0x105   : > { %v817_v17 = vpop.f32.mrf.mxu0 }
 0x106   : > { %v821_v19 = vpack.c.bf16 %v820_v16, %v820_v16  ;;  %v2385_v16 = vld [vmem:[%s3070_s15 + $0x30] sm:$0xff]   ;;  %v2386_v17 = vld [vmem:[%s3070_s15 + $0x28] sm:$0xff]  }
 0x107   : > { %v2129_v20 = vpop.f32.mrf.mxu0 }
 0x108   : > { %2133 = vmatmul.mubr.msk.bf16.vlgmr.msra.gmra.mxu1 %vm837_vm1, %v821_v19  ;;  %v2388_v19 = vld [vmem:[%s3070_s15 + $0x18] sm:$0xff]   ;;  %v2389_v20 = vld [vmem:[%s3070_s15 + $0x10] sm:$0xff]  }
 0x109   : > { %2137 = vmatpush3.bf16.msra.mxu1 %v2350_v18  ;;  %2152 = vmatprep.mubr.msk.bf16.mxu1 %vm2476_vm0, %v2475_v1  ;;  %v2387_v18 = vld [vmem:[%s3070_s15 + $0x20] sm:$0xff]  }
 0x10a   : > { %2138 = vmatprep.subr.bf16.mxu1 %v2475_v1 }
 0x10d   : > { %2139 = vmatpush3.bf16.msra.mxu1 %v2351_v21  ;;  %v2390_v21 = vld [vmem:[%s3070_s15 + $0x8] sm:$0xff]  }
 0x10e   : > { %2140 = vmatprep.subr.bf16.mxu1 %v2475_v1 }
 0x111   : > { %2141 = vmatpush3.bf16.msra.mxu1 %v2352_v22  ;;  %v2391_v22 = vld [vmem:[%s3070_s15] sm:$0xff]  }
 0x112   : > { %2142 = vmatprep.subr.bf16.mxu1 %v2475_v1 }
 0x115   : > { %2143 = vmatpush3.bf16.msra.mxu1 %v2353_v23  ;;  %v1965_v23 = vld [vmem:[%s3063_s8] ss:$0 sm:$0xff] }
 0x116   : > { %2144 = vmatprep.subr.bf16.mxu1 %v2475_v1 }
 0x119   : > { %2145 = vmatpush3.bf16.msra.mxu1 %v2354_v24 }
 0x11a   : > { %2146 = vmatprep.subr.bf16.mxu1 %v2475_v1 }
 0x11d   : > { %2147 = vmatpush3.bf16.msra.mxu1 %v2355_v25 }
 0x11e   : > { %2148 = vmatprep.subr.bf16.mxu1 %v2475_v1 }
 0x121   : > { %2149 = vmatpush3.bf16.msra.mxu1 %v2356_v26 }
 0x122   : > { %2150 = vmatprep.subr.bf16.mxu1 %v2475_v1 }
 0x125   : > { %2151 = vmatpush3.bf16.msra.mxu1 %v2357_v27 }
 0x126   : > { %2162 = vmatprep.subr.bf16.mxu1 %v2475_v1 }
 0x128   : > { %2153 = vmatmul.mubr.bf16.vlgmr.msra.gmra.mxu1 %v2695_v10 }
 0x129   : > { %2163 = vmatpush3.bf16.msra.mxu1 %v2358_v28  ;;  %2178 = vmatprep.mubr.msk.bf16.mxu1 %vm2476_vm0, %v2475_v1 }
 0x12a   : > { %2164 = vmatprep.subr.bf16.mxu1 %v2475_v1 }
 0x12d   : > { %2165 = vmatpush3.bf16.msra.mxu1 %v2359_v29 }
 0x12e   : > { %2166 = vmatprep.subr.bf16.mxu1 %v2475_v1 }
 0x131   : > { %2167 = vmatpush3.bf16.msra.mxu1 %v2360_v30  ;;  %v1977_v30 = vld [vmem:[%s3067_s12] ss:$0 sm:$0xff] }
 0x132   : > { %2168 = vmatprep.subr.bf16.mxu1 %v2475_v1 }
 0x135   : > { %2169 = vmatpush3.bf16.msra.mxu1 %v2361_v31 }
 0x136   : > { %2170 = vmatprep.subr.bf16.mxu1 %v2475_v1 }
 0x139   : > { %2171 = vmatpush3.bf16.msra.mxu1 %v2362_v32 }
 0x13a   : > { %2172 = vmatprep.subr.bf16.mxu1 %v2475_v1 }
 0x13d   : > { %2173 = vmatpush3.bf16.msra.mxu1 %v2363_v33 }
 0x13e   : > { %2174 = vmatprep.subr.bf16.mxu1 %v2475_v1 }
 0x141   : > { %2175 = vmatpush3.bf16.msra.mxu1 %v2364_v34 }
 0x142   : > { %2176 = vmatprep.subr.bf16.mxu1 %v2475_v1 }
 0x145   : > { %2177 = vmatpush3.bf16.msra.mxu1 %v2365_v35 }
 0x146   : > { %2208 = vmatprep.subr.bf16.mxu1 %v2475_v1 }
 0x148   : > { %2179 = vmatmul.mubr.bf16.vlgmr.msra.gmra.mxu1 %v2695_v10  ;;  %v1953_v10 = vld [vmem:[%s3111_s24] ss:$0 sm:$0xff]  ;;  %s701_s24 = scalar_lea.vmem [#allocation2], %s1942_s29 }
 0x149   : > { %2224 = vmatprep.mubr.msk.bf16.mxu1 %vm2476_vm0, %v2475_v1  ;;  %2209 = vmatpush3.bf16.msra.mxu1 %v2376_v37  ;;  %s1879_s26 = sshll.u32 %s701_s24, 4  ;;  %s3016_s26 = int_to_ptr.vmem [resolvable:$true] %s1879_s26 }
 0x14a   : > { %2210 = vmatprep.subr.bf16.mxu1 %v2475_v1  ;;  %s2413_s29 = scalar_lea.vmem %s3016_s26, 128  ;;  %p2420_p0 = scmp.lt.s32.totalorder %s3016_s26, %s2418_s1 }
 0x14b   : > { %p2414_p11 = scmp.ne.s32.totalorder %s3016_s26, %s2413_s29  ;;  %p2421_p1 = scmp.lt.s32.totalorder %s2419_s4, %s2413_s29 }
 0x14d   : > { %2211 = vmatpush3.bf16.msra.mxu1 %v2377_v38  ;;  %p2415_p12 = pnand %p2414_p11, %p2639_p5  ;;  %p2422_p2 = por %p2421_p1, %p2420_p0 }
 0x14e   : > { %2212 = vmatprep.subr.bf16.mxu1 %v2475_v1 }
 0x14f   : > { %p2416_p13 = pneg %p2415_p12 }
 0x151   : > { %2213 = vmatpush3.bf16.msra.mxu1 %v2378_v39  ;;  %p2423_p3 = pnand %p2422_p2, %p2416_p13 }
 0x152   : > { %2214 = vmatprep.subr.bf16.mxu1 %v2475_v1 }
 0x155   : > { %2215 = vmatpush3.bf16.msra.mxu1 %v2379_v40 }
 0x156   : > { %2216 = vmatprep.subr.bf16.mxu1 %v2475_v1 }
 0x159   : > { %2217 = vmatpush3.bf16.msra.mxu1 %v2380_v41  ;;  %v2392_v41 = vld [vmem:[%s3072_s17 + $0x38] sm:$0xff]  }
 0x15a   : > { %2218 = vmatprep.subr.bf16.mxu1 %v2475_v1 }
 0x15d   : > { %2219 = vmatpush3.bf16.msra.mxu1 %v2381_v42  ;;  %v2393_v42 = vld [vmem:[%s3072_s17 + $0x30] sm:$0xff]  }
 0x15e   : > { %2220 = vmatprep.subr.bf16.mxu1 %v2475_v1 }
 0x161   : > { %2221 = vmatpush3.bf16.msra.mxu1 %v2382_v43  ;;  %v2394_v43 = vld [vmem:[%s3072_s17 + $0x28] sm:$0xff]  }
 0x162   : > { %2222 = vmatprep.subr.bf16.mxu1 %v2475_v1 }
 0x165   : > { %2223 = vmatpush3.bf16.msra.mxu1 %v2383_v14  ;;  %v2477_v14 = vmov 2  }
 0x166   : > { %2248 = vmatprep.subr.bf16.mxu1 %v2475_v1  ;;  %2340 = vset.pattern.permute.xlu0 %v2477_v14 }
 0x1c8   : > { %v875_v44 = vpop.f32.mrf.mxu1 }
 0x1c9   : > { %v2862_v12 = vadd.f32 %v1953_v10, %v875_v44  ;;  %v2395_v44 = vld [vmem:[%s3072_s17 + $0x20] sm:$0xff]  }
 0x1ca   : > { %v2134_v45 = vpop.f32.mrf.mxu1 }
 0x1cb   : > { %v1224_v13 = vpack.c.bf16 %v2862_v12, %v2862_v12  ;;  %v2396_v45 = vld [vmem:[%s3072_s17 + $0x18] sm:$0xff]  }
 0x1cc   : > { %v878_v46 = vpop.f32.mrf.mxu1 }
 0x1cd   : > { %v2397_v46 = vld [vmem:[%s3072_s17 + $0x10] sm:$0xff]  }
 0x1ce   : > { %v2135_v47 = vpop.f32.mrf.mxu1 }
 0x1cf   : > { %v2398_v47 = vld [vmem:[%s3072_s17 + $0x8] sm:$0xff]  }
 0x1e8   : > { %v986_v49 = vpop.f32.mrf.mxu1 }
 0x1e9   : > { %v987_v50 = vadd.f32 %v1956_v48, %v986_v49  ;;  %v2399_v48 = vld [vmem:[%s3072_s17] sm:$0xff]  }
 0x1ea   : > { %v2154_v51 = vpop.f32.mrf.mxu1 }
 0x1eb   : > { %v992_v52 = vmax.f32 %v987_v50, 0.0 }
 0x1ec   : > { %v989_v53 = vpop.f32.mrf.mxu1 }
 0x1ed   : > { %v993_v55 = vpack.c.bf16 %v992_v52, %v992_v52  ;;  %v1988_v53 = vld [vmem:[%s3071_s16] ss:$0 sm:$0xff] }
 0x1ee   : > { %v2155_v56 = vpop.f32.mrf.mxu1 }
 0x1ef   : > { %2159 = vmatmul.mubr.msk.bf16.vlgmr.msra.gmra.mxu0 %vm837_vm1, %v993_v55 }
 0x1f0   : > { %2183 = vmatpush3.bf16.msra.mxu0 %v2367_v54  ;;  %2184 = vmatprep.mubr.msk.bf16.mxu0 %vm2476_vm0, %v2475_v1 }
 0x1f1   : > { %2188 = vmatprep.subr.bf16.mxu0 %v2475_v1 }
 0x208   : > { %v1157_v58 = vpop.f32.mrf.mxu1 }
 0x209   : > { %v1158_v59 = vadd.f32 %v1968_v57, %v1157_v58 }
 0x20a   : > { %v2180_v60 = vpop.f32.mrf.mxu1 }
 0x20b   : > { %v1163_v61 = vmax.f32 %v1158_v59, 0.0 }
 0x20c   : > { %v1160_v62 = vpop.f32.mrf.mxu1 }
 0x20d   : > { %v1164_v0 = vpack.c.bf16 %v1163_v61, %v1163_v61 }
 0x20e   : > { %v2181_v2 = vpop.f32.mrf.mxu1 }
 0x20f   : > { %2185 = vmatmul.mubr.msk.bf16.vlgmr.msra.gmra.mxu0 %vm837_vm1, %v1164_v0 }
 0x210   : > { %2189 = vmatpush3.bf16.msra.mxu0 %v2368_v63  ;;  %2204 = vmatprep.mubr.msk.bf16.mxu0 %vm2476_vm0, %v2475_v1  ;;  %v2005_v63 = vld [vmem:[%s3073_s18] ss:$0 sm:$0xff] }
 0x211   : > { %2190 = vmatprep.subr.bf16.mxu0 %v2475_v1 }
 0x214   : > { %2191 = vmatpush3.bf16.msra.mxu0 %v2369_v3 }
 0x215   : > { %2192 = vmatprep.subr.bf16.mxu0 %v2475_v1 }
 0x218   : > { %2193 = vmatpush3.bf16.msra.mxu0 %v2370_v4 }
 0x219   : > { %2194 = vmatprep.subr.bf16.mxu0 %v2475_v1 }
 0x21c   : > { %2195 = vmatpush3.bf16.msra.mxu0 %v2371_v5 }
 0x21d   : > { %2196 = vmatprep.subr.bf16.mxu0 %v2475_v1 }
 0x220   : > { %2197 = vmatpush3.bf16.msra.mxu0 %v2372_v6 }
 0x221   : > { %2198 = vmatprep.subr.bf16.mxu0 %v2475_v1 }
 0x224   : > { %2199 = vmatpush3.bf16.msra.mxu0 %v2373_v7 }
 0x225   : > { %2200 = vmatprep.subr.bf16.mxu0 %v2475_v1 }
 0x228   : > { %2201 = vmatpush3.bf16.msra.mxu0 %v2374_v8 }
 0x229   : > { %2202 = vmatprep.subr.bf16.mxu0 %v2475_v1 }
 0x22c   : > { %2203 = vmatpush3.bf16.msra.mxu0 %v2375_v11 }
 0x22d   : > { %2228 = vmatprep.subr.bf16.mxu0 %v2475_v1 }
 0x22f   : > { %2205 = vmatmul.mubr.bf16.vlgmr.msra.gmra.mxu0 %v1224_v13 }
 0x230   : > { %2244 = vmatprep.mubr.msk.bf16.mxu0 %vm2476_vm0, %v2475_v1  ;;  %2229 = vmatpush3.bf16.msra.mxu0 %v2384_v15  ;;  %v2478_v15 = vmov 0  }
 0x231   : > { %2230 = vmatprep.subr.bf16.mxu0 %v2475_v1  ;;  %2338 = vset.pattern.permute.xlu1 %v2478_v15 }
 0x234   : > { %2231 = vmatpush3.bf16.msra.mxu0 %v2385_v16  ;;  %v2400_v16 = vld [vmem:[%s3074_s19 + $0x38] sm:$0xff]  }
 0x235   : > { %2232 = vmatprep.subr.bf16.mxu0 %v2475_v1 }
 0x238   : > { %2233 = vmatpush3.bf16.msra.mxu0 %v2386_v17  ;;  %v2401_v17 = vld [vmem:[%s3074_s19 + $0x30] sm:$0xff]  }
 0x239   : > { %2234 = vmatprep.subr.bf16.mxu0 %v2475_v1 }
 0x23c   : > { %2235 = vmatpush3.bf16.msra.mxu0 %v2387_v18  ;;  %v2402_v18 = vld [vmem:[%s3074_s19 + $0x28] sm:$0xff]  }
 0x23d   : > { %2236 = vmatprep.subr.bf16.mxu0 %v2475_v1 }
 0x240   : > { %2237 = vmatpush3.bf16.msra.mxu0 %v2388_v19  ;;  %v2403_v19 = vld [vmem:[%s3074_s19 + $0x20] sm:$0xff]  }
 0x241   : > { %2238 = vmatprep.subr.bf16.mxu0 %v2475_v1 }
 0x244   : > { %2239 = vmatpush3.bf16.msra.mxu0 %v2389_v20  ;;  %v2404_v20 = vld [vmem:[%s3074_s19 + $0x18] sm:$0xff]  }
 0x245   : > { %2240 = vmatprep.subr.bf16.mxu0 %v2475_v1 }
 0x248   : > { %2241 = vmatpush3.bf16.msra.mxu0 %v2390_v21 }
 0x249   : > { %2242 = vmatprep.subr.bf16.mxu0 %v2475_v1 }
 0x24c   : > { %2243 = vmatpush3.bf16.msra.mxu0 %v2391_v22  ;;  %v2405_v22 = vld [vmem:[%s3074_s19 + $0x10] sm:$0xff]  }
 0x24d   : > { %2268 = vmatprep.subr.bf16.mxu0 %v2475_v1 }
 0x2af   : > { %v1046_v24 = vpop.f32.mrf.mxu0 }
 0x2b0   : > { %v2909_v25 = vadd.f32 %v1965_v23, %v1046_v24 }
 0x2b1   : > { %v2160_v26 = vpop.f32.mrf.mxu0 }
 0x2b2   : > { %v1336_v27 = vpack.c.bf16 %v2909_v25, %v2909_v25  ;;  %v2406_v26 = vld [vmem:[%s3074_s19 + $0x8] sm:$0xff]  }
 0x2b3   : > { %v1049_v28 = vpop.f32.mrf.mxu0 }
 0x2b4   : > { %2225 = vmatmul.mubr.bf16.vlgmr.msra.gmra.mxu1 %v1336_v27  ;;  %v2479_v27 = vmov 1   ;;  %v2407_v28 = vld [vmem:[%s3074_s19] sm:$0xff]  }
 0x2b5   : > { %v2161_v29 = vpop.f32.mrf.mxu0  ;;  %2264 = vmatprep.mubr.msk.bf16.mxu1 %vm2476_vm0, %v2475_v1  ;;  %2249 = vmatpush3.bf16.msra.mxu1 %v2392_v41 }
 0x2b6   : > { %2250 = vmatprep.subr.bf16.mxu1 %v2475_v1  ;;  %v2408_v29 = vld [vmem:[%s3076_s21] sm:$0xff]  }
 0x2b9   : > { %2251 = vmatpush3.bf16.msra.mxu1 %v2393_v42 }
 0x2ba   : > { %2252 = vmatprep.subr.bf16.mxu1 %v2475_v1 }
 0x2bd   : > { %2253 = vmatpush3.bf16.msra.mxu1 %v2394_v43 }
 0x2be   : > { %2254 = vmatprep.subr.bf16.mxu1 %v2475_v1 }
 0x2c1   : > { %2255 = vmatpush3.bf16.msra.mxu1 %v2395_v44 }
 0x2c2   : > { %2256 = vmatprep.subr.bf16.mxu1 %v2475_v1 }
 0x2c5   : > { %2257 = vmatpush3.bf16.msra.mxu1 %v2396_v45 }
 0x2c6   : > { %2258 = vmatprep.subr.bf16.mxu1 %v2475_v1 }
 0x2c9   : > { %2259 = vmatpush3.bf16.msra.mxu1 %v2397_v46 }
 0x2ca   : > { %2260 = vmatprep.subr.bf16.mxu1 %v2475_v1 }
 0x2cd   : > { %2261 = vmatpush3.bf16.msra.mxu1 %v2398_v47 }
 0x2ce   : > { %2262 = vmatprep.subr.bf16.mxu1 %v2475_v1 }
 0x2cf   : > { %v1217_v31 = vpop.f32.mrf.mxu0 }
 0x2d0   : > { %v2918_v32 = vadd.f32 %v1977_v30, %v1217_v31 }
 0x2d1   : > { %v2186_v33 = vpop.f32.mrf.mxu0  ;;  %2263 = vmatpush3.bf16.msra.mxu1 %v2399_v48 }
 0x2d2   : > { %v1442_v34 = vpack.c.bf16 %v2918_v32, %v2918_v32  ;;  %2288 = vmatprep.subr.bf16.mxu1 %v2475_v1 }
 0x2d3   : > { %v1220_v35 = vpop.f32.mrf.mxu0 }
 0x2d4   : > { %2245 = vmatmul.mubr.bf16.vlgmr.msra.gmra.mxu0 %v1442_v34 }
 0x2d5   : > { %v2187_v36 = vpop.f32.mrf.mxu0  ;;  %2284 = vmatprep.mubr.msk.bf16.mxu0 %vm2476_vm0, %v2475_v1  ;;  %2269 = vmatpush3.bf16.msra.mxu0 %v2400_v16 }
 0x2d6   : > { %2270 = vmatprep.subr.bf16.mxu0 %v2475_v1 }
 0x2d9   : > { %2271 = vmatpush3.bf16.msra.mxu0 %v2401_v17 }
 0x2da   : > { %2272 = vmatprep.subr.bf16.mxu0 %v2475_v1 }
 0x2dd   : > { %2273 = vmatpush3.bf16.msra.mxu0 %v2402_v18 }
 0x2de   : > { %2274 = vmatprep.subr.bf16.mxu0 %v2475_v1 }
 0x2e1   : > { %2275 = vmatpush3.bf16.msra.mxu0 %v2403_v19 }
 0x2e2   : > { %2276 = vmatprep.subr.bf16.mxu0 %v2475_v1 }
 0x2e5   : > { %2277 = vmatpush3.bf16.msra.mxu0 %v2404_v20 }
 0x2e6   : > { %2278 = vmatprep.subr.bf16.mxu0 %v2475_v1 }
 0x2e9   : > { %2279 = vmatpush3.bf16.msra.mxu0 %v2405_v22 }
 0x2ea   : > { %2280 = vmatprep.subr.bf16.mxu0 %v2475_v1 }
 0x2ed   : > { %2281 = vmatpush3.bf16.msra.mxu0 %v2406_v26 }
 0x2ee   : > { %2282 = vmatprep.subr.bf16.mxu0 %v2475_v1 }
 0x2ef   : > { %v1323_v37 = vpop.f32.mrf.mxu0 }
 0x2f0   : > { %v1335_v54 = vadd.f32 %v1988_v53, %v1323_v37 }
 0x2f1   : > { %v2206_v38 = vpop.f32.mrf.mxu0  ;;  %2283 = vmatpush3.bf16.msra.mxu0 %v2407_v28 }
 0x2f3   : > { %v1326_v39 = vpop.f32.mrf.mxu0 }
 0x2f4   : > { %v2014_v39 = vld [vmem:[%s3075_s20] ss:$0 sm:$0xff] }
 0x2f5   : > { %v2207_v40 = vpop.f32.mrf.mxu0 }
 0x374   : > { %v1435_v49 = vpop.f32.mrf.mxu1 }
 0x375   : > { %v1441_v55 = vadd.f32 %v1435_v49, %v1335_v54 }
 0x376   : > { %v2226_v50 = vpop.f32.mrf.mxu1 }
 0x378   : > { %v1438_v51 = vpop.f32.mrf.mxu1 }
 0x37a   : > { %v2227_v52 = vpop.f32.mrf.mxu1 }
 0x394   : > { %v1541_v56 = vpop.f32.mrf.mxu0 }
 0x395   : > { %v1547_v57 = vadd.f32 %v1541_v56, %v1441_v55 }
 0x396   : > { %v2246_v58 = vpop.f32.mrf.mxu0 }
 0x397   : > { %v1548_v59 = vmax.f32 %v1547_v57, 0.0 }
 0x398   : > { %v1544_v60 = vpop.f32.mrf.mxu0 }
 0x399   : > { %v1549_v61 = vpack.c.bf16 %v1548_v59, %v1548_v59 }
 0x39a   : > { %v2247_v62 = vpop.f32.mrf.mxu0 }
 0x39b   : > { %2265 = vmatmul.mubr.bf16.vlgmr.msra.gmra.mxu1 %v1549_v61 }
 0x39c   : > { %2290 = vmatprep.mubr.msk.bf16.mxu1 %vm2476_vm0, %v2475_v1  ;;  %2289 = vmatpush3.bf16.msra.mxu1 %v2408_v29 }
 0x45b   : > { %v1655_v0 = vpop.f32.mrf.mxu1 }
 0x45c   : > { %v1656_v2 = vadd.f32 %v2005_v63, %v1655_v0 }
 0x45d   : > { %v2266_v3 = vpop.f32.mrf.mxu1 }
 0x45e   : > { %v1662_v4 = vsel %vm1661_vm2, %v1656_v2, -inf }
 0x45f   : > { %1663 = vmax.xlane.f32.xlu0 %v1662_v4  ;;  %v1658_v5 = vpop.f32.mrf.mxu1 }
 0x461   : > { %v2267_v6 = vpop.f32.mrf.mxu1 }
 0x4e8   : > { %v1664_v7 = vpop.xlane.xlu0 %1663 }
 0x4e9   : > { %v1665_v8 = vsub.f32 %v1656_v2, %v1664_v7 }
 0x4eb   : > { %v1666_v10 = vmul.f32 1.442695, %v1665_v8 }
 0x4ed   : > { %2409 = vpow2.f32 %v1666_v10 }
 0x4fa   : > { %v2410_v11 = vpop.eup %2409 }
 0x4fb   : > { %v1668_v13 = vsel %vm1661_vm2, %v2410_v11, 0.0 }
 0x4fc   : > { %1669 = vadd.xlane.f32.xlu0 %v1668_v13 }
 0x585   : > { %v1670_v21 = vpop.xlane.xlu0 %1669 }
 0x586   : > { %2411 = vrcp.f32 %v1670_v21 }
 0x593   : > { %v2412_v23 = vpop.eup %2411 }
 0x594   : > { %v1672_v24 = vmul.f32 %v2412_v23, %v2410_v11 }
 0x596   : > { %1686 = vperm.xlu0 %2340, %v1672_v24   ;;  %1675 = vperm.xlu1 %2338, %v1672_v24  }
 0x59a   : > { %2339 = vset.pattern.permute.xlu1 %v2479_v27 }
 0x59b   : > { %1680 = vperm.xlu1 %2339, %v1672_v24  }
 0x611   : > { %v1676_v30 = vpop.permute.xlu1 %1675  ;;  %v1687_v31 = vpop.permute.xlu0 %1686 }
 0x612   : > { %v1678_v34 = vmul.f32 %v1676_v30, %v2862_v12  ;;  %v1689_v1 = vmul.f32 %v1687_v31, %v2918_v32 }
 0x616   : > { %v1681_v33 = vpop.permute.xlu1 %1680 }
 0x617   : > { %v1683_v35 = vmul.f32 %v1681_v33, %v2909_v25  ;;  %v2023_v25 = vld [vmem:[%s3077_s22] ss:$0 sm:$0xff] }
 0x619   : > { %v1684_v36 = vadd.f32 %v1683_v35, %v1678_v34 }
 0x61b   : > { %v1690_v37 = vadd.f32 %v1689_v1, %v1684_v36 }
 0x61d   : > { %v1691_v38 = vpack.c.bf16 %v1690_v37, %v1690_v37 }
 0x61f   : > { %2285 = vmatmul.mubr.bf16.vlgmr.msra.gmra.mxu0 %v1691_v38 }
 0x6df   : > { %v1797_v40 = vpop.f32.mrf.mxu0 }
 0x6e0   : > { %v1798_v41 = vadd.f32 %v2014_v39, %v1797_v40 }
 0x6e1   : > { %v2286_v42 = vpop.f32.mrf.mxu0 }
 0x6e2   : > { %v1803_v43 = vmax.f32 %v1798_v41, 0.0 }
 0x6e3   : > { %v1800_v44 = vpop.f32.mrf.mxu0 }
 0x6e4   : > { %v1804_v12 = vpack.c.bf16 %v1803_v43, %v1803_v43 }
 0x6e5   : > { %v2287_v45 = vpop.f32.mrf.mxu0 }
 0x6e6   : > { %2291 = vmatmul.mubr.msk.bf16.vlgmr.msra.gmra.mxu1 %vm837_vm1, %v1804_v12 }
 0x7a6   : > { %v1857_v32 = vpop.f32.mrf.mxu1 }
 0x7a7   : > { %v1858_v46 = vadd.f32 %v2023_v25, %v1857_v32 }
 0x7a8   : > { %v2292_v47 = vpop.f32.mrf.mxu1 }
 0x7a9   : > { %v1863_v48 = vadd.f32 %v1858_v46, %v2690_v9 }
 0x7aa   : > { %v1860_v49 = vpop.f32.mrf.mxu1 }
 0x7ab   : > { %1864 = vst [vmem:[%s701_s24] sm:$0xff] %v1863_v48 }
 0x7ac   : > { %v2293_v50 = vpop.f32.mrf.mxu1 }
 0x7ad   : > { %2426 = shalt.err (!%p2423_p3)
}
 0x7ae   : > { %s2427_s6 = scalar_lea.hbm %s3014_s28, 128  ;;  %s2431_s27 = scalar_lea.hbm %s3078_s23, 256 }
 0x7af   : > { %p2428_p4 = scmp.ne.s32.totalorder %s3014_s28, %s2427_s6  ;;  %p2432_p9 = scmp.lt.s32.totalorder %s3014_s28, %s3078_s23 }
 0x7b0   : > { %p2433_p10 = scmp.lt.s32.totalorder %s2431_s27, %s2427_s6 }
 0x7b1   : > { %p2429_p7 = pnand %p2428_p4, %p2639_p5 }
 0x7b2   : > { %p2434_p11 = por %p2433_p10, %p2432_p9 }
 0x7b3   : > { %p2430_p8 = pneg %p2429_p7 }
 0x7b5   : > { %p2435_p12 = pnand %p2434_p11, %p2430_p8 }
 0x7b7   : > { %2438 = shalt.err (!%p2435_p12)
}
 0x7b8   : > { %2294 = dma.vmem_to_hbm [thread:$0]  (%p2639_p5), %s3016_s26, 128, %s3014_s28, %s1866_s5  }
 0x7b9 PF: > { %s3112_s29 = sld [smem:[#allocation7_spill]] }
 0x7ba   : > { %s3113_s1 = sld [smem:[#allocation5_spill]] }
 0x7bf   : > { %p2300_p13 = scmp.ge.s32.totalorder %s3112_s29, 2 }
 0x7c0   : > { %s1891_s25 = sand.u32 1, %s3113_s1  }
 0x7c1   : > { %p2297_p0 = pnand %p2300_p13, %p2643_p6  ;;  %s1892_s0 = scalar_lea.sflag [#allocation3], %s1891_s25 }
 0x7c3   : > { %p2298_p1 = pneg %p2297_p0 }
 0x7c5   : > { %2456 = dma.done.wait (%p2298_p1), %s1892_s0, 128  }
 0x7c6   : > { %2458 = vsyncadd (%p2298_p1), %s1892_s0, 4294967168  ;;  %s3115_s25 = sld [smem:[#allocation8_spill]]  ;;  %s3118_s4 = smov %s2465_s30 }
 0x7c7   : > { %s3116_s6 = sld [smem:[#allocation6_spill]] }
 0x7c8   : > { %s3117_s24 = sld [smem:[#allocation9_spill]] }
 0x7cc   : > { %p33_p2 = scmp.ge.s32.totalorder %s3115_s25, 4  }
 0x7cd   : > { %s3119_s30 = smov %s3116_s6 }
 0x7ce   :  { %35 = sbr.rel (!%p33_p2) target bundleno = 12 (0xc), region = 147 }
 0x7d3   :  { %1897 = vsyncpa [#allocation3], 1 }
 0x7d4   :  { %1899 = vsyncpa [#allocation3 + $0x1], 1 }

</bundles_post_ra>
